<compile_context>
chip_gen: v7x
topology: tpu7x:2x2x1
jax: 0.10.0
libtpu: 0.0.40
codegen_flags: <defaults>
</compile_context>

<pallas_src>
import numpy as np
import jax
import jax.numpy as jnp
from jax.experimental import pallas as pl
from jax.experimental.pallas import tpu as pltpu


# ---------------------------------------------------------------------------
# Sizes (real vs lane-dense padded)
# ---------------------------------------------------------------------------
C, CP = 50, 128          # conv channels (real / padded to 128 lanes)
HID, HIDP = 500, 512     # linear1 width
NCLS, NCLSP = 10, 128    # linear2 width
TM_MAX = 512             # row-tile upper bound (≈5 MB VMEM/block incl. double buffer)
_VMEM_LIMIT = 32 * 1024 * 1024


def _round_up(x, m):
    return ((x + m - 1) // m) * m


def _pick_tm(m):
    return min(TM_MAX, _round_up(max(m, 1), 8))


# ---------------------------------------------------------------------------
# Pallas kernels
# ---------------------------------------------------------------------------
def _conv_pool_kernel(p_ref, w_ref, b_ref, o_ref):
    """Fused 3x3 conv (im2col matmul) + bias + ReLU + 2x2 max-pool.

    p_ref: [4*TM, K] bf16 - 4 pool-window im2col slabs, interleaved per row tile
    w_ref: [K, CP] bf16, b_ref: [1, CP] f32, o_ref: [TM, CP] bf16
    """
    t = o_ref.shape[0]
    y = jnp.dot(p_ref[...], w_ref[...], preferred_element_type=jnp.float32)
    m = jnp.maximum(jnp.maximum(y[0:t], y[t:2 * t]),
                    jnp.maximum(y[2 * t:3 * t], y[3 * t:4 * t]))
    o_ref[...] = jnp.maximum(m + b_ref[...], 0.0).astype(o_ref.dtype)


def _log_softmax_masked(logits):
    col = jax.lax.broadcasted_iota(jnp.int32, logits.shape, 1)
    logits = jnp.where(col < NCLS, logits, jnp.float32(-1e30))  # mask padded classes
    mx = jnp.max(logits, axis=-1, keepdims=True)
    s = jnp.sum(jnp.exp(logits - mx), axis=-1, keepdims=True)
    return logits - mx - jnp.log(s)


def _head_kernel(x_ref, w1_ref, b1_ref, w2_ref, b2_ref, o_ref):
    """Fused linear1 + ReLU + linear2 + log_softmax (first NCLS real cols)."""
    h = jnp.dot(x_ref[...], w1_ref[...], preferred_element_type=jnp.float32)
    h = jnp.maximum(h + b1_ref[...], 0.0)
    logits = jnp.dot(h.astype(jnp.bfloat16), w2_ref[...],
                     preferred_element_type=jnp.float32) + b2_ref[...]
    o_ref[...] = _log_softmax_masked(logits).astype(o_ref.dtype)


def _conv3_head_kernel(p_ref, wc_ref, bc_ref, w1_ref, b1_ref, w2_ref, b2_ref, o_ref):
    """Fused conv3+pool+ReLU  ->  linear1+ReLU+linear2+log_softmax (common path)."""
    t = o_ref.shape[0]
    y = jnp.dot(p_ref[...], wc_ref[...], preferred_element_type=jnp.float32)
    m = jnp.maximum(jnp.maximum(y[0:t], y[t:2 * t]),
                    jnp.maximum(y[2 * t:3 * t], y[3 * t:4 * t]))
    rows = jnp.maximum(m + bc_ref[...], 0.0)            # [TM, CP]; padded chans == 0
    h = jnp.dot(rows.astype(jnp.bfloat16), w1_ref[...], preferred_element_type=jnp.float32)
    h = jnp.maximum(h + b1_ref[...], 0.0)
    logits = jnp.dot(h.astype(jnp.bfloat16), w2_ref[...],
                     preferred_element_type=jnp.float32) + b2_ref[...]
    o_ref[...] = _log_softmax_masked(logits).astype(o_ref.dtype)


# ---------------------------------------------------------------------------
# im2col glue (pure data movement in XLA)
# ---------------------------------------------------------------------------
def _im2col_pool(x_nhwc, cin):
    """Build the 4 pool-window im2col slabs: [4, M, 9*cin] bf16 (no K padding)."""
    N, H, W, _ = x_nhwc.shape
    Hp, Wp = (H - 2) // 2, (W - 2) // 2
    x = x_nhwc[..., :cin]
    slabs = []
    for jh in range(2):
        for jw in range(2):
            taps = [x[:, jh + kh: jh + kh + 2 * Hp: 2,
                      jw + kw: jw + kw + 2 * Wp: 2, :]
                    for kh in range(3) for kw in range(3)]
            slabs.append(jnp.concatenate(taps, axis=-1).reshape(N * Hp * Wp, 9 * cin))
    return jnp.stack(slabs, axis=0).astype(jnp.bfloat16), (N, Hp, Wp)


def _interleave(patches, tm):
    """[4, M, K] -> [(M/TM)*4*TM, K]: the 4 pool slabs of each TM-row tile contiguous."""
    _, M, K = patches.shape
    mp = _round_up(M, tm)
    if mp != M:
        patches = jnp.pad(patches, ((0, 0), (0, mp - M), (0, 0)))
    g = mp // tm
    return patches.reshape(4, g, tm, K).transpose(1, 0, 2, 3).reshape(g * 4 * tm, K), mp


def _mosaic_params():
    return pltpu.CompilerParams(dimension_semantics=("parallel",),
                                vmem_limit_bytes=_VMEM_LIMIT)


# ---------------------------------------------------------------------------
# Pallas wrappers
# ---------------------------------------------------------------------------
def conv_pool(x_nhwc, w_packed, b_packed, cin):
    """y = maxpool2x2(relu(conv3x3(x) + b)); NHWC in -> NHWC out (padded chans, bf16)."""
    K, cpad = w_packed.shape
    patches, (N, Hp, Wp) = _im2col_pool(x_nhwc, cin)
    M = N * Hp * Wp
    tm = _pick_tm(M)
    p_int, mp = _interleave(patches, tm)
    g = mp // tm
    out = pl.pallas_call(
        _conv_pool_kernel,
        out_shape=jax.ShapeDtypeStruct((mp, cpad), jnp.bfloat16),
        grid=(g,),
        in_specs=[pl.BlockSpec((4 * tm, K), lambda i: (i, 0)),
                  pl.BlockSpec((K, cpad), lambda i: (0, 0)),
                  pl.BlockSpec((1, cpad), lambda i: (0, 0))],
        out_specs=pl.BlockSpec((tm, cpad), lambda i: (i, 0)),
        compiler_params=_mosaic_params(),
        cost_estimate=pl.CostEstimate(
            flops=2 * 4 * mp * K * cpad, transcendentals=0,
            bytes_accessed=4 * mp * K * 2 + K * cpad * 2 + mp * cpad * 2),
    )(p_int, w_packed, b_packed)
    return out[:M].reshape(N, Hp, Wp, cpad)


# ---------------------------------------------------------------------------
# Parameters (deterministic, synthetic - shapes match the torch module; padded once)
# ---------------------------------------------------------------------------
def init_params(key):
    ks = jax.random.split(key, 10)

    def w(k, shape, scale=0.05):
        return (scale * jax.random.normal(k, shape)).astype(jnp.float32)

    def pack_conv(wk, cin):                       # HWIO (3,3,cin,C) -> [9*cin, CP] bf16
        m = wk.reshape(9 * cin, C)
        return jnp.pad(m, ((0, 0), (0, CP - C))).astype(jnp.bfloat16)

    def pack_decide(wt, hp, wp):                  # torch NCHW-flatten -> NHWC-flatten + chan pad
        n_out = wt.shape[1]
        m = wt.reshape(C, hp, wp, n_out).transpose(1, 2, 0, 3)
        m = jnp.pad(m, ((0, 0), (0, 0), (0, CP - C), (0, 0)))
        return m.reshape(hp * wp * CP, n_out)

    def pad_bias(npad):
        return jnp.zeros((1, npad), jnp.float32)  # torch-equivalent biases are zero here

    c1_w, c2_w, c3_w = w(ks[0], (3, 3, 1, C)), w(ks[1], (3, 3, C, C)), w(ks[2], (3, 3, C, C))
    l1_w, l2_w = w(ks[3], (C, HID)), w(ks[4], (HID, NCLS))

    return {
        # lane-dense bf16 weights for the Pallas MXU kernels (padded once, at init)
        "c1_wp": pack_conv(c1_w, 1), "c1_bp": pad_bias(CP),      # [9, 128]
        "c2_wp": pack_conv(c2_w, C), "c2_bp": pad_bias(CP),      # [450, 128]
        "c3_wp": pack_conv(c3_w, C), "c3_bp": pad_bias(CP),      # [450, 128]
        "l1_wp": jnp.zeros((CP, HIDP), jnp.float32).at[:C, :HID].set(l1_w).astype(jnp.bfloat16),
        "l1_bp": pad_bias(HIDP),
        "l2_wp": jnp.zeros((HIDP, NCLSP), jnp.float32).at[:HID, :NCLS].set(l2_w).astype(jnp.bfloat16),
        "l2_bp": pad_bias(NCLSP),
        # decision heads: NHWC flatten order + channel pad folded into the weights at init.
        # Decision biases force route 0 -> 0 so the demo batch follows one shape-consistent
        # path (the torch model likewise crashes if routing mixes incompatible branches).
        "d1_wp": pack_decide(w(ks[5], (C * 13 * 13, 3)), 13, 13),
        "decide1_b": jnp.array([100.0, 0.0, 0.0], jnp.float32),
        "d2_wp": pack_decide(w(ks[6], (C * 5 * 5, 2)), 5, 5),
        "decide2_b": jnp.array([100.0, 0.0], jnp.float32),
        # cold-branch linears
        "c1_c3_w": w(ks[7], (13, 13)), "c1_c3_b": jnp.zeros((13,), jnp.float32),
        "c1_l1_w": w(ks[8], (1, HID)), "c1_l1_b": jnp.zeros((HID,), jnp.float32),
        "c2_l1_w": w(ks[9], (5, HID)), "c2_l1_b": jnp.zeros((HID,), jnp.float32),
    }


# ---------------------------------------------------------------------------
# Jitted stages (all device work between host routing syncs is one XLA program)
# ---------------------------------------------------------------------------
@jax.jit
def _stage1(params, x_nchw):
    x_nhwc = jnp.transpose(x_nchw, (0, 2, 3, 1))                     # boundary transpose (once)
    a1 = conv_pool(x_nhwc, params["c1_wp"], params["c1_bp"], cin=1)  # [N,13,13,128] bf16
    feat = a1.reshape(a1.shape[0], -1).astype(jnp.float32)           # NHWC flatten (weight permuted)
    logits = feat @ params["d1_wp"] + params["decide1_b"]
    return a1, jnp.argmax(logits, axis=1)


@jax.jit
def _stage2(params, c2_nhwc):
    a2 = conv_pool(c2_nhwc, params["c2_wp"], params["c2_bp"], cin=C)  # [*,5,5,128] bf16
    feat = a2.reshape(a2.shape[0], -1).astype(jnp.float32)
    logits = feat @ params["d2_wp"] + params["decide2_b"]
    return a2, jnp.argmax(logits, axis=1)


@jax.jit
def _stage3_head(params, c3_input_nhwc):
    """Common path: conv3 + pool + classifier head fused in ONE pallas kernel."""
    patches, (N, Hp, Wp) = _im2col_pool(c3_input_nhwc, cin=C)
    M = N * Hp * Wp
    K = patches.shape[-1]
    tm = _pick_tm(M)
    p_int, mp = _interleave(patches, tm)
    g = mp // tm
    out = pl.pallas_call(
        _conv3_head_kernel,
        out_shape=jax.ShapeDtypeStruct((mp, NCLSP), jnp.float32),
        grid=(g,),
        in_specs=[pl.BlockSpec((4 * tm, K), lambda i: (i, 0)),
                  pl.BlockSpec((K, CP), lambda i: (0, 0)),
                  pl.BlockSpec((1, CP), lambda i: (0, 0)),
                  pl.BlockSpec((CP, HIDP), lambda i: (0, 0)),
                  pl.BlockSpec((1, HIDP), lambda i: (0, 0)),
                  pl.BlockSpec((HIDP, NCLSP), lambda i: (0, 0)),
                  pl.BlockSpec((1, NCLSP), lambda i: (0, 0))],
        out_specs=pl.BlockSpec((tm, NCLSP), lambda i: (i, 0)),
        compiler_params=_mosaic_params(),
        cost_estimate=pl.CostEstimate(
            flops=2 * mp * (4 * K * CP + CP * HIDP + HIDP * NCLSP),
            transcendentals=mp * NCLSP,
            bytes_accessed=4 * mp * K * 2
            + (K * CP + CP * HIDP + HIDP * NCLSP) * 2 + mp * NCLSP * 4),
    )(p_int, params["c3_wp"], params["c3_bp"],
      params["l1_wp"], params["l1_bp"], params["l2_wp"], params["l2_bp"])
    return out[:M, :NCLS]


@jax.jit
def _stage3(params, c3_input_nhwc):
    """Cold path: conv3 alone (head rows come from several branches)."""
    a3 = conv_pool(c3_input_nhwc, params["c3_wp"], params["c3_bp"], cin=C)
    # TODO(synk): for multi-spatial conv3 inputs torch's NCHW .view(-1,50) interleaves
    # channel/spatial; we emit per-position channel rows (cold path only).
    return a3[..., :C].reshape(-1, C).astype(jnp.float32)


@jax.jit
def _head(params, rows):
    """Cold path classifier head (linear1+ReLU+linear2+log_softmax)."""
    M = rows.shape[0]
    tm = _pick_tm(M)
    mp = _round_up(M, tm)
    x = jnp.pad(rows, ((0, mp - M), (0, CP - C))).astype(jnp.bfloat16)
    g = mp // tm
    out = pl.pallas_call(
        _head_kernel,
        out_shape=jax.ShapeDtypeStruct((mp, NCLSP), jnp.float32),
        grid=(g,),
        in_specs=[pl.BlockSpec((tm, CP), lambda i: (i, 0)),
                  pl.BlockSpec((CP, HIDP), lambda i: (0, 0)),
                  pl.BlockSpec((1, HIDP), lambda i: (0, 0)),
                  pl.BlockSpec((HIDP, NCLSP), lambda i: (0, 0)),
                  pl.BlockSpec((1, NCLSP), lambda i: (0, 0))],
        out_specs=pl.BlockSpec((tm, NCLSP), lambda i: (i, 0)),
        compiler_params=_mosaic_params(),
        cost_estimate=pl.CostEstimate(
            flops=2 * mp * (CP * HIDP + HIDP * NCLSP), transcendentals=mp * NCLSP,
            bytes_accessed=mp * CP * 2 + (CP * HIDP + HIDP * NCLSP) * 2 + mp * NCLSP * 4),
    )(x, params["l1_wp"], params["l1_bp"], params["l2_wp"], params["l2_bp"])
    return out[:M, :NCLS]


# Cold branches (empty on the demo path) — tiny, plain XLA under jit.
@jax.jit
def _c33_branch(params, c3_nhwc):
    x = jnp.transpose(c3_nhwc[..., :C], (0, 3, 1, 2)).astype(jnp.float32)  # [*,50,13,13]
    y = x @ params["c1_c3_w"] + params["c1_c3_b"]                          # Linear over W
    return jnp.transpose(y, (0, 2, 3, 1))                                  # NHWC for conv3


@jax.jit
def _l11_branch(params, l11_nhwc):
    x = jnp.transpose(l11_nhwc[..., :C], (0, 3, 1, 2)).astype(jnp.float32)  # [*,50,13,13]
    p = jnp.max(x[:, :, :7, :7], axis=(2, 3), keepdims=True)                # max_pool2d(7,7)
    return p @ params["c1_l1_w"] + params["c1_l1_b"]                        # [*,50,1,500]


@jax.jit
def _l12_branch(params, l12_nhwc):
    x = jnp.transpose(l12_nhwc[..., :C], (0, 3, 1, 2)).astype(jnp.float32)  # [*,50,5,5]
    y = x @ params["c2_l1_w"] + params["c2_l1_b"]                           # [*,50,5,500]
    yw = y[:, :, :3, :498].reshape(y.shape[0], C, 1, 3, 166, 3)
    return jnp.max(yw, axis=(3, 5))                                         # max_pool2d(3,3)


# ---------------------------------------------------------------------------
# Forward (mirrors ThreeLayerCNN.forward; routing index lists require host sync
# exactly like the torch .numpy() calls)
# ---------------------------------------------------------------------------
def forward(params, x):
    a1, d1_dev = _stage1(params, x)
    d1 = np.asarray(jax.device_get(d1_dev))                       # sync #1 (routing)
    c2_idx = np.nonzero(d1 == 0)[0].tolist()
    c3_idx = np.nonzero(d1 == 1)[0].tolist()
    l11_idx = np.nonzero(d1 == 2)[0].tolist()

    c2_in = jnp.take(a1, jnp.asarray(c2_idx, jnp.int32), axis=0)
    c3_in = jnp.take(a1, jnp.asarray(c3_idx, jnp.int32), axis=0)
    l11_in = jnp.take(a1, jnp.asarray(l11_idx, jnp.int32), axis=0)

    if len(c2_idx) > 0:
        a2, d2_dev = _stage2(params, c2_in)
        d2 = np.asarray(jax.device_get(d2_dev))                   # sync #2 (routing)
    else:
        a2 = jnp.zeros((0, 5, 5, CP), jnp.bfloat16)
        d2 = np.zeros((0,), np.int64)

    c32_idx = np.nonzero(d2 == 0)[0].tolist()
    l12_idx = np.nonzero(d2 == 1)[0].tolist()
    real_c32_idx = [c2_idx[i] for i in c32_idx]
    real_l12_idx = [c2_idx[i] for i in l12_idx]
    c32 = jnp.take(a2, jnp.asarray(c32_idx, jnp.int32), axis=0)
    l12_in = jnp.take(a2, jnp.asarray(l12_idx, jnp.int32), axis=0)

    c33 = _c33_branch(params, c3_in) if len(c3_idx) > 0 else None
    l11 = _l11_branch(params, l11_in) if len(l11_idx) > 0 else None
    l12 = _l12_branch(params, l12_in) if len(l12_idx) > 0 else None

    real_c3_idx = real_c32_idx + c3_idx
    order = l11_idx + real_l12_idx + real_c3_idx

    # TODO(synk): torch.cat((c32, c33)) only works when at most one is non-empty (their
    # spatial shapes differ); we use whichever is non-empty, like the later `holder` filter.
    c3_parts = []
    if len(c32_idx) > 0:
        c3_parts.append(c32)
    if c33 is not None:
        c3_parts.append(c33)

    if l11 is None and l12 is None and len(c3_parts) == 1:
        # Fast fused path (demo path): conv3 + classifier head in ONE pallas kernel.
        logp = _stage3_head(params, c3_parts[0])
    else:
        if c3_parts:
            c3_input = c3_parts[0] if len(c3_parts) == 1 else jnp.concatenate(c3_parts, axis=0)
            c3_rows = _stage3(params, c3_input)
        else:
            c3_rows = jnp.zeros((0, C), jnp.float32)
        holder = [t.reshape(-1, C) for t in (l11, l12, c3_rows)
                  if t is not None and t.size > 0]
        rows = jnp.concatenate(holder, axis=0)
        logp = _head(params, rows)

    # per-stage perf_counter timings dropped (async dispatch makes them meaningless);
    # keep the return arity of the torch module.
    timings = (0.0, 0.0, 0.0, 0.0, 0.0)
    return logp, order, (l11_idx, c3_idx, real_l12_idx), timings


# ---------------------------------------------------------------------------
if __name__ == "__main__":
    key = jax.random.PRNGKey(0)
    pkey, xkey = jax.random.split(key)
    params = init_params(pkey)
    # MNIST-like input implied by decide1's 50*13*13 features: NCHW [2,1,28,28]
    x = jax.random.normal(xkey, (2, 1, 28, 28), dtype=jnp.float32)

    logp, order, idx_groups, timings = forward(params, x)
    logp = jax.block_until_ready(logp)

    assert logp.shape == (2, 10), logp.shape
    probs_sum = np.exp(np.asarray(logp)).sum(axis=1)
    assert np.allclose(probs_sum, 1.0, atol=1e-3), probs_sum
    assert sorted(order) == [0, 1], order
    print("KERNEL_OK")
</pallas_src>

<mosaic_0001>
module attributes {stable_mosaic.version = 11 : i64} {
  func.func @_conv_pool_kernel(%arg0: i32, %arg1: memref<1376x9xbf16, #tpu.memory_space<vmem>>, %arg2: memref<9x128xbf16, #tpu.memory_space<vmem>>, %arg3: memref<1x128xf32, #tpu.memory_space<vmem>>, %arg4: memref<344x128xbf16, #tpu.memory_space<vmem>>) attributes {dimension_semantics = [#tpu.dimension_semantics<parallel>], iteration_bounds = array<i64: 1>, scalar_prefetch = 0 : i64, scratch_operands = 0 : i64, tpu.core_type = #tpu.core_type<tc>, window_params = [{transform_indices = @transform_0, window_bounds = array<i64: 1376, 9>}, {pipeline_mode = #tpu.pipeline_mode<synchronous>, transform_indices = @transform_1, window_bounds = array<i64: 9, 128>}, {pipeline_mode = #tpu.pipeline_mode<synchronous>, transform_indices = @transform_2, window_bounds = array<i64: 1, 128>}, {transform_indices = @transform_3, window_bounds = array<i64: 344, 128>}]} {
    %c0 = arith.constant 0 : index
    %c0_0 = arith.constant 0 : index
    %0 = vector.load %arg1[%c0, %c0_0] : memref<1376x9xbf16, #tpu.memory_space<vmem>>, vector<1376x9xbf16>
    %c0_1 = arith.constant 0 : index
    %c0_2 = arith.constant 0 : index
    %1 = vector.load %arg2[%c0_1, %c0_2] : memref<9x128xbf16, #tpu.memory_space<vmem>>, vector<9x128xbf16>
    %cst = arith.constant dense<0.000000e+00> : vector<1376x128xf32>
    %2 = tpu.matmul %0, %1, %cst {dimension_numbers = #tpu.dot_dimension_numbers<[1], [0], [0], [1], [0, 0, 1, 1], [], []>} : vector<1376x9xbf16>, vector<9x128xbf16>, vector<1376x128xf32> -> vector<1376x128xf32>
    %3 = vector.extract_strided_slice %2 {offsets = [0, 0], sizes = [344, 128], strides = [1, 1]} : vector<1376x128xf32> to vector<344x128xf32>
    %4 = vector.extract_strided_slice %2 {offsets = [344, 0], sizes = [344, 128], strides = [1, 1]} : vector<1376x128xf32> to vector<344x128xf32>
    %5 = arith.maximumf %3, %4 : vector<344x128xf32>
    %6 = vector.extract_strided_slice %2 {offsets = [688, 0], sizes = [344, 128], strides = [1, 1]} : vector<1376x128xf32> to vector<344x128xf32>
    %7 = vector.extract_strided_slice %2 {offsets = [1032, 0], sizes = [344, 128], strides = [1, 1]} : vector<1376x128xf32> to vector<344x128xf32>
    %8 = arith.maximumf %6, %7 : vector<344x128xf32>
    %9 = arith.maximumf %5, %8 : vector<344x128xf32>
    %c0_3 = arith.constant 0 : index
    %c0_4 = arith.constant 0 : index
    %10 = vector.load %arg3[%c0_3, %c0_4] : memref<1x128xf32, #tpu.memory_space<vmem>>, vector<1x128xf32>
    %11 = vector.broadcast %10 : vector<1x128xf32> to vector<344x128xf32>
    %12 = arith.addf %9, %11 : vector<344x128xf32>
    %cst_5 = arith.constant 0.000000e+00 : f32
    %13 = vector.broadcast %cst_5 : f32 to vector<344x128xf32>
    %14 = arith.maximumf %12, %13 : vector<344x128xf32>
    %15 = arith.truncf %14 : vector<344x128xf32> to vector<344x128xbf16>
    %c0_6 = arith.constant 0 : index
    %c0_7 = arith.constant 0 : index
    %16 = vector.load %arg4[%c0_6, %c0_7] : memref<344x128xbf16, #tpu.memory_space<vmem>>, vector<344x128xbf16>
    tpu.vector_store %arg4[%c0_6, %c0_7], %15 {strides = array<i32>} : memref<344x128xbf16, #tpu.memory_space<vmem>>, vector<344x128xbf16>,
    return
  }
  func.func @transform_0(%arg0: i32) -> (i32, i32) {
    %c0_i32 = arith.constant 0 : i32
    %c0_i32_0 = arith.constant 0 : i32
    return %arg0, %c0_i32 : i32, i32
  }
  func.func @transform_1(%arg0: i32) -> (i32, i32) {
    %c0_i32 = arith.constant 0 : i32
    %c0_i32_0 = arith.constant 0 : i32
    %c0_i32_1 = arith.constant 0 : i32
    return %c0_i32, %c0_i32_0 : i32, i32
  }
  func.func @transform_2(%arg0: i32) -> (i32, i32) {
    %c0_i32 = arith.constant 0 : i32
    %c0_i32_0 = arith.constant 0 : i32
    %c0_i32_1 = arith.constant 0 : i32
    return %c0_i32, %c0_i32_0 : i32, i32
  }
  func.func @transform_3(%arg0: i32) -> (i32, i32) {
    %c0_i32 = arith.constant 0 : i32
    %c0_i32_0 = arith.constant 0 : i32
    return %arg0, %c0_i32 : i32, i32
  }
}

</mosaic_0001>

<bundles_post_ra>
// kernel: _stage1.1
= control target key start
LH: loop header
LB: loop body
LE: loop exit
PB: predicated region body
PF: predicated region fallthrough
CT: control target
= control target key end

     0   :  { %vm883_vm0 = vcmask 1043456   ;;  %vm884_vm1 = vcmask 1044480   ;;  %vm624_vm2 = vcmask 72704   ;;  %v2789_v1 = vmov 65535   ;;  %s3541_s1 = inlined_call_operand.vmem [shape: bf16[9,128], index: 1, kind: input, shape index: {}]   ;;  %s3542_s0 = inlined_call_operand.vmem [shape: bf16[1376,9], index: 0, kind: input, shape index: {}]   ;;  %s3543_s2 = inlined_call_operand.vmem [shape: f32[1,128], index: 2, kind: input, shape index: {}]   ;;  %s3544_s3 = inlined_call_operand.vmem [shape: bf16[344,128], index: 3, kind: output, shape index: {}]  }
   0x1   :  { %v2702_v0 = vld [vmem:[%s3541_s1] sm:$0x1f]   ;;  %v885_v2 = vsel %vm883_vm0, 4294967295, %v2789_v1  ;;  %v2705_v7 = vld [vmem:[%s3542_s0 + $0x8] sm:$0xff]   ;;  %v2707_v9 = vld [vmem:[%s3542_s0 + $0x10] sm:$0xff]  }
   0x2   :  { %v2703_v3 = vld [vmem:[%s3542_s0] sm:$0xff]   ;;  %v886_v4 = vsel %vm884_vm1, %v885_v2, 0  ;;  %v2706_v8 = vld [vmem:[%s3542_s0 + $0x168] sm:$0xff]   ;;  %v2708_v10 = vld [vmem:[%s3542_s0 + $0x170] sm:$0xff]  }
   0x3   :  { %v2704_v5 = vld [vmem:[%s3542_s0 + $0x160] sm:$0xff]   ;;  %v888_v6 = vand.u32 %v2702_v0, %v886_v4  ;;  %2527 = vmatprep.mubr.msk.bf16.mxu0 %vm624_vm2, %v2703_v3  ;;  %v2709_v11 = vld [vmem:[%s3542_s0 + $0x18] sm:$0xff]   ;;  %v2713_v15 = vld [vmem:[%s3542_s0 + $0x28] sm:$0xff]  }
   0x4   :  { %2615 = vmatprep.mubr.msk.bf16.mxu1 %vm624_vm2, %v2704_v5  ;;  %v2710_v12 = vld [vmem:[%s3542_s0 + $0x178] sm:$0xff]   ;;  %v2711_v13 = vld [vmem:[%s3542_s0 + $0x20] sm:$0xff]   ;;  %v2714_v16 = vld [vmem:[%s3542_s0 + $0x188] sm:$0xff]  }
   0x5   :  { %2525 = vmatprep.subr.bf16.mxu0 %v888_v6  ;;  %2699 = vmatprep.subr.bf16.mxu1 %v888_v6  ;;  %v2712_v14 = vld [vmem:[%s3542_s0 + $0x180] sm:$0xff]   ;;  %v2715_v17 = vld [vmem:[%s3542_s0 + $0x30] sm:$0xff]   ;;  %v2717_v19 = vld [vmem:[%s3542_s0 + $0x38] sm:$0xff]  }
   0x6   :  { %2526 = vmatpush3.bf16.msra.mxu0 %v888_v6  ;;  %2700 = vmatpush3.bf16.msra.mxu1 %v888_v6  ;;  %v2716_v18 = vld [vmem:[%s3542_s0 + $0x190] sm:$0xff]   ;;  %v2718_v20 = vld [vmem:[%s3542_s0 + $0x198] sm:$0xff]   ;;  %v2719_v21 = vld [vmem:[%s3542_s0 + $0x40] sm:$0xff]  }
   0x7   :  { %v2720_v22 = vld [vmem:[%s3542_s0 + $0x1a0] sm:$0xff]   ;;  %v2721_v23 = vld [vmem:[%s3542_s0 + $0x48] sm:$0xff]   ;;  %v2723_v25 = vld [vmem:[%s3542_s0 + $0x50] sm:$0xff]  }
   0x8   :  { %v2722_v24 = vld [vmem:[%s3542_s0 + $0x1a8] sm:$0xff]   ;;  %v2724_v26 = vld [vmem:[%s3542_s0 + $0x1b0] sm:$0xff]   ;;  %v2725_v27 = vld [vmem:[%s3542_s0 + $0x58] sm:$0xff]  }
   0x9   :  { %2528 = vmatmul.mubr.msk.bf16.vlgmr.msra.gmra.mrb[0].mxu0 %vm624_vm2, %v2705_v7  ;;  %2616 = vmatmul.mubr.msk.bf16.vlgmr.msra.gmra.mrb[0].mxu1 %vm624_vm2, %v2706_v8  ;;  %v2726_v28 = vld [vmem:[%s3542_s0 + $0x1b8] sm:$0xff]   ;;  %v2727_v29 = vld [vmem:[%s3542_s0 + $0x60] sm:$0xff]   ;;  %v2729_v31 = vld [vmem:[%s3542_s0 + $0x68] sm:$0xff]  }
   0xa   :  { %2531 = vmatprep.mubr.msk.bf16.mxu0 %vm624_vm2, %v2707_v9  ;;  %2619 = vmatprep.mubr.msk.bf16.mxu1 %vm624_vm2, %v2708_v10  ;;  %v2728_v30 = vld [vmem:[%s3542_s0 + $0x1c0] sm:$0xff]   ;;  %v2730_v32 = vld [vmem:[%s3542_s0 + $0x1c8] sm:$0xff]   ;;  %v2731_v33 = vld [vmem:[%s3542_s0 + $0x70] sm:$0xff]  }
   0xb   :  { %v2732_v34 = vld [vmem:[%s3542_s0 + $0x1d0] sm:$0xff]   ;;  %v2733_v35 = vld [vmem:[%s3542_s0 + $0x78] sm:$0xff]   ;;  %v2735_v37 = vld [vmem:[%s3542_s0 + $0x80] sm:$0xff]  }
   0xc   :  { %v2734_v36 = vld [vmem:[%s3542_s0 + $0x1d8] sm:$0xff]   ;;  %v2736_v38 = vld [vmem:[%s3542_s0 + $0x1e0] sm:$0xff]   ;;  %v2737_v39 = vld [vmem:[%s3542_s0 + $0x88] sm:$0xff]  }
   0xd   :  { %v2738_v40 = vld [vmem:[%s3542_s0 + $0x1e8] sm:$0xff]   ;;  %v2739_v41 = vld [vmem:[%s3542_s0 + $0x90] sm:$0xff]   ;;  %v2741_v43 = vld [vmem:[%s3542_s0 + $0x98] sm:$0xff]  }
   0xe   :  { %v2740_v42 = vld [vmem:[%s3542_s0 + $0x1f0] sm:$0xff]   ;;  %v2742_v44 = vld [vmem:[%s3542_s0 + $0x1f8] sm:$0xff]   ;;  %v2743_v45 = vld [vmem:[%s3542_s0 + $0xa0] sm:$0xff]  }
   0xf   :  { %v2744_v46 = vld [vmem:[%s3542_s0 + $0x200] sm:$0xff]   ;;  %v2745_v47 = vld [vmem:[%s3542_s0 + $0xa8] sm:$0xff]   ;;  %v2747_v49 = vld [vmem:[%s3542_s0 + $0xb0] sm:$0xff]  }
  0x10   :  { %v2746_v48 = vld [vmem:[%s3542_s0 + $0x208] sm:$0xff]   ;;  %v2748_v50 = vld [vmem:[%s3542_s0 + $0x210] sm:$0xff]   ;;  %v2749_v51 = vld [vmem:[%s3542_s0 + $0xb8] sm:$0xff]  }
  0x11   :  { %2532 = vmatmul.mubr.msk.bf16.gmra.mrb[4].mxu0 %vm624_vm2, %v2709_v11  ;;  %2620 = vmatmul.mubr.msk.bf16.gmra.mrb[4].mxu1 %vm624_vm2, %v2710_v12  ;;  %v2750_v52 = vld [vmem:[%s3542_s0 + $0x218] sm:$0xff]   ;;  %v2751_v53 = vld [vmem:[%s3542_s0 + $0xc0] sm:$0xff]   ;;  %v2753_v55 = vld [vmem:[%s3542_s0 + $0xc8] sm:$0xff]  }
  0x12   :  { %2535 = vmatprep.mubr.msk.bf16.mxu0 %vm624_vm2, %v2711_v13  ;;  %2623 = vmatprep.mubr.msk.bf16.mxu1 %vm624_vm2, %v2712_v14  ;;  %v2752_v54 = vld [vmem:[%s3542_s0 + $0x220] sm:$0xff]   ;;  %v2754_v56 = vld [vmem:[%s3542_s0 + $0x228] sm:$0xff]   ;;  %v2755_v57 = vld [vmem:[%s3542_s0 + $0xd0] sm:$0xff]  }
  0x13   :  { %v2756_v58 = vld [vmem:[%s3542_s0 + $0x230] sm:$0xff]   ;;  %v2757_v59 = vld [vmem:[%s3542_s0 + $0xd8] sm:$0xff]   ;;  %v2759_v61 = vld [vmem:[%s3542_s0 + $0xe0] sm:$0xff]  }
  0x14   :  { %v2758_v60 = vld [vmem:[%s3542_s0 + $0x238] sm:$0xff]   ;;  %v2760_v62 = vld [vmem:[%s3542_s0 + $0x240] sm:$0xff]   ;;  %v2761_v63 = vld [vmem:[%s3542_s0 + $0xe8] sm:$0xff]  }
  0x15   :  { %v2762_v0 = vld [vmem:[%s3542_s0 + $0x248] sm:$0xff]   ;;  %v2763_v1 = vld [vmem:[%s3542_s0 + $0xf0] sm:$0xff]   ;;  %v2765_v3 = vld [vmem:[%s3542_s0 + $0xf8] sm:$0xff]  }
  0x16   :  { %v2764_v2 = vld [vmem:[%s3542_s0 + $0x250] sm:$0xff]   ;;  %v2766_v4 = vld [vmem:[%s3542_s0 + $0x258] sm:$0xff]   ;;  %v2767_v5 = vld [vmem:[%s3542_s0 + $0x100] sm:$0xff]  }
  0x17   :  { %v2768_v6 = vld [vmem:[%s3542_s0 + $0x260] sm:$0xff]   ;;  %v2769_v7 = vld [vmem:[%s3542_s0 + $0x108] sm:$0xff]   ;;  %v2771_v9 = vld [vmem:[%s3542_s0 + $0x110] sm:$0xff]  }
  0x18   :  { %v2770_v8 = vld [vmem:[%s3542_s0 + $0x268] sm:$0xff]   ;;  %v2772_v10 = vld [vmem:[%s3542_s0 + $0x270] sm:$0xff]   ;;  %v2773_v11 = vld [vmem:[%s3542_s0 + $0x118] sm:$0xff]  }
  0x19   :  { %2536 = vmatmul.mubr.msk.bf16.gmra.mrb[8].mxu0 %vm624_vm2, %v2713_v15  ;;  %2624 = vmatmul.mubr.msk.bf16.gmra.mrb[8].mxu1 %vm624_vm2, %v2714_v16  ;;  %v2774_v12 = vld [vmem:[%s3542_s0 + $0x278] sm:$0xff]   ;;  %v2775_v13 = vld [vmem:[%s3542_s0 + $0x120] sm:$0xff]   ;;  %v2777_v15 = vld [vmem:[%s3542_s0 + $0x128] sm:$0xff]  }
  0x1a   :  { %2539 = vmatprep.mubr.msk.bf16.mxu0 %vm624_vm2, %v2715_v17  ;;  %2627 = vmatprep.mubr.msk.bf16.mxu1 %vm624_vm2, %v2716_v18  ;;  %v2776_v14 = vld [vmem:[%s3542_s0 + $0x280] sm:$0xff]   ;;  %v2778_v16 = vld [vmem:[%s3542_s0 + $0x288] sm:$0xff]   ;;  %v2779_v17 = vld [vmem:[%s3542_s0 + $0x130] sm:$0xff]  }
  0x1b   :  { %v2780_v18 = vld [vmem:[%s3542_s0 + $0x290] sm:$0xff]  }
  0x21   :  { %2540 = vmatmul.mubr.msk.bf16.gmra.mrb[12].mxu0 %vm624_vm2, %v2717_v19  ;;  %2628 = vmatmul.mubr.msk.bf16.gmra.mrb[12].mxu1 %vm624_vm2, %v2718_v20  ;;  %v2781_v19 = vld [vmem:[%s3542_s0 + $0x138] sm:$0xff]  }
  0x22   :  { %2543 = vmatprep.mubr.msk.bf16.mxu0 %vm624_vm2, %v2719_v21  ;;  %2631 = vmatprep.mubr.msk.bf16.mxu1 %vm624_vm2, %v2720_v22  ;;  %v2782_v20 = vld [vmem:[%s3542_s0 + $0x298] sm:$0xff]   ;;  %v2783_v21 = vld [vmem:[%s3542_s0 + $0x140] sm:$0xff]  }
  0x23   :  { %v2784_v22 = vld [vmem:[%s3542_s0 + $0x2a0] sm:$0xff]  }
  0x29   :  { %2544 = vmatmul.mubr.msk.bf16.gmra.mrb[16].mxu0 %vm624_vm2, %v2721_v23  ;;  %2632 = vmatmul.mubr.msk.bf16.gmra.mrb[16].mxu1 %vm624_vm2, %v2722_v24  ;;  %v2785_v23 = vld [vmem:[%s3542_s0 + $0x148] sm:$0xff]  }
  0x2a   :  { %2547 = vmatprep.mubr.msk.bf16.mxu0 %vm624_vm2, %v2723_v25  ;;  %2635 = vmatprep.mubr.msk.bf16.mxu1 %vm624_vm2, %v2724_v26  ;;  %v2786_v24 = vld [vmem:[%s3542_s0 + $0x2a8] sm:$0xff]   ;;  %v2787_v25 = vld [vmem:[%s3542_s0 + $0x150] sm:$0xff]   ;;  %v2788_v26 = vld [vmem:[%s3542_s0 + $0x158] sm:$0xff]  }
  0x31   :  { %2548 = vmatmul.mubr.msk.bf16.gmra.mrb[20].mxu0 %vm624_vm2, %v2725_v27  ;;  %2636 = vmatmul.mubr.msk.bf16.gmra.mrb[20].mxu1 %vm624_vm2, %v2726_v28 }
  0x32   :  { %2551 = vmatprep.mubr.msk.bf16.mxu0 %vm624_vm2, %v2727_v29  ;;  %2639 = vmatprep.mubr.msk.bf16.mxu1 %vm624_vm2, %v2728_v30 }
  0x39   :  { %2552 = vmatmul.mubr.msk.bf16.gmra.mrb[24].mxu0 %vm624_vm2, %v2729_v31  ;;  %2640 = vmatmul.mubr.msk.bf16.gmra.mrb[24].mxu1 %vm624_vm2, %v2730_v32 }
  0x3a   :  { %2555 = vmatprep.mubr.msk.bf16.mxu0 %vm624_vm2, %v2731_v33  ;;  %2643 = vmatprep.mubr.msk.bf16.mxu1 %vm624_vm2, %v2732_v34 }
  0x41   :  { %2556 = vmatmul.mubr.msk.bf16.gmra.mrb[28].mxu0 %vm624_vm2, %v2733_v35  ;;  %2644 = vmatmul.mubr.msk.bf16.gmra.mrb[28].mxu1 %vm624_vm2, %v2734_v36 }
  0x42   :  { %2559 = vmatprep.mubr.msk.bf16.mxu0 %vm624_vm2, %v2735_v37  ;;  %2647 = vmatprep.mubr.msk.bf16.mxu1 %vm624_vm2, %v2736_v38 }
  0x49   :  { %2560 = vmatmul.mubr.msk.bf16.gmra.mrb[32].mxu0 %vm624_vm2, %v2737_v39  ;;  %2648 = vmatmul.mubr.msk.bf16.gmra.mrb[32].mxu1 %vm624_vm2, %v2738_v40 }
  0x4a   :  { %2563 = vmatprep.mubr.msk.bf16.mxu0 %vm624_vm2, %v2739_v41  ;;  %2651 = vmatprep.mubr.msk.bf16.mxu1 %vm624_vm2, %v2740_v42 }
  0x51   :  { %2564 = vmatmul.mubr.msk.bf16.gmra.mrb[36].mxu0 %vm624_vm2, %v2741_v43  ;;  %2652 = vmatmul.mubr.msk.bf16.gmra.mrb[36].mxu1 %vm624_vm2, %v2742_v44 }
  0x52   :  { %2567 = vmatprep.mubr.msk.bf16.mxu0 %vm624_vm2, %v2743_v45  ;;  %2655 = vmatprep.mubr.msk.bf16.mxu1 %vm624_vm2, %v2744_v46 }
  0x59   :  { %2568 = vmatmul.mubr.msk.bf16.gmra.mrb[40].mxu0 %vm624_vm2, %v2745_v47  ;;  %2656 = vmatmul.mubr.msk.bf16.gmra.mrb[40].mxu1 %vm624_vm2, %v2746_v48 }
  0x5a   :  { %2571 = vmatprep.mubr.msk.bf16.mxu0 %vm624_vm2, %v2747_v49  ;;  %2659 = vmatprep.mubr.msk.bf16.mxu1 %vm624_vm2, %v2748_v50 }
  0x61   :  { %2572 = vmatmul.mubr.msk.bf16.gmra.mrb[44].mxu0 %vm624_vm2, %v2749_v51  ;;  %2660 = vmatmul.mubr.msk.bf16.gmra.mrb[44].mxu1 %vm624_vm2, %v2750_v52 }
  0x62   :  { %2575 = vmatprep.mubr.msk.bf16.mxu0 %vm624_vm2, %v2751_v53  ;;  %2663 = vmatprep.mubr.msk.bf16.mxu1 %vm624_vm2, %v2752_v54 }
  0x69   :  { %2576 = vmatmul.mubr.msk.bf16.gmra.mrb[48].mxu0 %vm624_vm2, %v2753_v55  ;;  %2664 = vmatmul.mubr.msk.bf16.gmra.mrb[48].mxu1 %vm624_vm2, %v2754_v56 }
  0x6a   :  { %2579 = vmatprep.mubr.msk.bf16.mxu0 %vm624_vm2, %v2755_v57  ;;  %2667 = vmatprep.mubr.msk.bf16.mxu1 %vm624_vm2, %v2756_v58 }
  0x71   :  { %2580 = vmatmul.mubr.msk.bf16.gmra.mrb[52].mxu0 %vm624_vm2, %v2757_v59  ;;  %2668 = vmatmul.mubr.msk.bf16.gmra.mrb[52].mxu1 %vm624_vm2, %v2758_v60 }
  0x72   :  { %2583 = vmatprep.mubr.msk.bf16.mxu0 %vm624_vm2, %v2759_v61  ;;  %2671 = vmatprep.mubr.msk.bf16.mxu1 %vm624_vm2, %v2760_v62 }
  0x79   :  { %2584 = vmatmul.mubr.msk.bf16.gmra.mrb[56].mxu0 %vm624_vm2, %v2761_v63  ;;  %2672 = vmatmul.mubr.msk.bf16.gmra.mrb[56].mxu1 %vm624_vm2, %v2762_v0 }
  0x7a   :  { %2587 = vmatprep.mubr.msk.bf16.mxu0 %vm624_vm2, %v2763_v1  ;;  %2675 = vmatprep.mubr.msk.bf16.mxu1 %vm624_vm2, %v2764_v2 }
  0x81   :  { %2588 = vmatmul.mubr.msk.bf16.gmra.mrb[60].mxu0 %vm624_vm2, %v2765_v3  ;;  %2676 = vmatmul.mubr.msk.bf16.gmra.mrb[60].mxu1 %vm624_vm2, %v2766_v4 }
  0x82   :  { %2591 = vmatprep.mubr.msk.bf16.mxu0 %vm624_vm2, %v2767_v5  ;;  %2679 = vmatprep.mubr.msk.bf16.mxu1 %vm624_vm2, %v2768_v6 }
  0x89   :  { %2592 = vmatmul.mubr.msk.bf16.gmra.mrb[64].mxu0 %vm624_vm2, %v2769_v7  ;;  %2680 = vmatmul.mubr.msk.bf16.gmra.mrb[64].mxu1 %vm624_vm2, %v2770_v8 }
  0x8a   :  { %2595 = vmatprep.mubr.msk.bf16.mxu0 %vm624_vm2, %v2771_v9  ;;  %2683 = vmatprep.mubr.msk.bf16.mxu1 %vm624_vm2, %v2772_v10 }
  0x91   :  { %2596 = vmatmul.mubr.msk.bf16.gmra.mrb[68].mxu0 %vm624_vm2, %v2773_v11  ;;  %2684 = vmatmul.mubr.msk.bf16.gmra.mrb[68].mxu1 %vm624_vm2, %v2774_v12 }
  0x92   :  { %2599 = vmatprep.mubr.msk.bf16.mxu0 %vm624_vm2, %v2775_v13  ;;  %2687 = vmatprep.mubr.msk.bf16.mxu1 %vm624_vm2, %v2776_v14 }
  0x99   :  { %2600 = vmatmul.mubr.msk.bf16.gmra.mrb[72].mxu0 %vm624_vm2, %v2777_v15  ;;  %2688 = vmatmul.mubr.msk.bf16.gmra.mrb[72].mxu1 %vm624_vm2, %v2778_v16 }
  0x9a   :  { %2603 = vmatprep.mubr.msk.bf16.mxu0 %vm624_vm2, %v2779_v17  ;;  %2691 = vmatprep.mubr.msk.bf16.mxu1 %vm624_vm2, %v2780_v18 }
  0xa1   :  { %2604 = vmatmul.mubr.msk.bf16.gmra.mrb[76].mxu0 %vm624_vm2, %v2781_v19  ;;  %2692 = vmatmul.mubr.msk.bf16.gmra.mrb[76].mxu1 %vm624_vm2, %v2782_v20 }
  0xa2   :  { %2607 = vmatprep.mubr.msk.bf16.mxu0 %vm624_vm2, %v2783_v21  ;;  %2695 = vmatprep.mubr.msk.bf16.mxu1 %vm624_vm2, %v2784_v22 }
  0xa9   :  { %2608 = vmatmul.mubr.msk.bf16.gmra.mrb[80].mxu0 %vm624_vm2, %v2785_v23  ;;  %2696 = vmatmul.mubr.msk.bf16.gmra.mrb[80].mxu1 %vm624_vm2, %v2786_v24 }
  0xaa   :  { %2611 = vmatprep.mubr.msk.bf16.mxu0 %vm624_vm2, %v2787_v25 }
  0xb1   :  { %2612 = vmatmul.mubr.msk.bf16.gmra.mrb[84].mxu0 %vm624_vm2, %v2788_v26 }
  0xdc   :  { %v3157_v27 = vpop.f32.mrb[0].mxu0  ;;  %v3159_v28 = vpop.f32.mrb[0].mxu1 }
  0xdd   :  { %v3161_v29 = vpop.f32.mrb[1].mxu0  ;;  %v3163_v30 = vpop.f32.mrb[1].mxu1 }
  0xde   :  { %3549 = vst [vmem:[#allocation2_spill] sm:$0xff] %v3161_v29  ;;  %v3165_v31 = vpop.f32.mrb[2].mxu0  ;;  %v3167_v32 = vpop.f32.mrb[2].mxu1 }
  0xdf   :  { %v3169_v33 = vpop.f32.mrb[3].mxu0  ;;  %v3171_v34 = vpop.f32.mrb[3].mxu1 }
  0xe0   :  { %3550 = vst [vmem:[#allocation3_spill] sm:$0xff] %v3169_v33 }
  0xe4   :  { %v3173_v35 = vpop.f32.mrb[4].mxu0  ;;  %v3175_v36 = vpop.f32.mrb[4].mxu1 }
  0xe5   :  { %v3177_v37 = vpop.f32.mrb[5].mxu0  ;;  %v3179_v38 = vpop.f32.mrb[5].mxu1 }
  0xe6   :  { %v3181_v39 = vpop.f32.mrb[6].mxu0  ;;  %v3183_v40 = vpop.f32.mrb[6].mxu1 }
  0xe7   :  { %v3185_v41 = vpop.f32.mrb[7].mxu0  ;;  %v3187_v42 = vpop.f32.mrb[7].mxu1 }
  0xec   :  { %v3189_v43 = vpop.f32.mrb[8].mxu0  ;;  %v3191_v44 = vpop.f32.mrb[8].mxu1 }
  0xed   :  { %v3193_v45 = vpop.f32.mrb[9].mxu0  ;;  %v3195_v46 = vpop.f32.mrb[9].mxu1 }
  0xee   :  { %v3197_v47 = vpop.f32.mrb[10].mxu0  ;;  %v3199_v48 = vpop.f32.mrb[10].mxu1 }
  0xef   :  { %v3201_v49 = vpop.f32.mrb[11].mxu0  ;;  %v3203_v50 = vpop.f32.mrb[11].mxu1 }
  0xf4   :  { %v3205_v51 = vpop.f32.mrb[12].mxu0  ;;  %v3207_v52 = vpop.f32.mrb[12].mxu1 }
  0xf5   :  { %v3209_v53 = vpop.f32.mrb[13].mxu0  ;;  %v3211_v54 = vpop.f32.mrb[13].mxu1 }
  0xf6   :  { %v3213_v55 = vpop.f32.mrb[14].mxu0  ;;  %v3215_v56 = vpop.f32.mrb[14].mxu1 }
  0xf7   :  { %v3217_v57 = vpop.f32.mrb[15].mxu0  ;;  %v3219_v58 = vpop.f32.mrb[15].mxu1 }
  0xfc   :  { %v3221_v59 = vpop.f32.mrb[16].mxu0  ;;  %v3223_v60 = vpop.f32.mrb[16].mxu1 }
  0xfd   :  { %v3225_v61 = vpop.f32.mrb[17].mxu0  ;;  %v3227_v62 = vpop.f32.mrb[17].mxu1 }
  0xfe   :  { %v3229_v63 = vpop.f32.mrb[18].mxu0  ;;  %v3231_v0 = vpop.f32.mrb[18].mxu1 }
  0xff   :  { %v3233_v1 = vpop.f32.mrb[19].mxu0  ;;  %v3235_v2 = vpop.f32.mrb[19].mxu1 }
 0x104   :  { %v3237_v3 = vpop.f32.mrb[20].mxu0  ;;  %v3239_v4 = vpop.f32.mrb[20].mxu1 }
 0x105   :  { %3551 = vst [vmem:[#allocation4_spill] sm:$0xff] %v3239_v4  ;;  %v3241_v5 = vpop.f32.mrb[21].mxu0  ;;  %v3243_v6 = vpop.f32.mrb[21].mxu1 }
 0x106   :  { %v3245_v7 = vpop.f32.mrb[22].mxu0  ;;  %v3247_v8 = vpop.f32.mrb[22].mxu1 }
 0x107   :  { %v3249_v9 = vpop.f32.mrb[23].mxu0  ;;  %v3251_v10 = vpop.f32.mrb[23].mxu1 }
 0x10c   :  { %v3253_v11 = vpop.f32.mrb[24].mxu0  ;;  %v3255_v12 = vpop.f32.mrb[24].mxu1 }
 0x10d   :  { %3552 = vst [vmem:[#allocation5_spill] sm:$0xff] %v3253_v11  ;;  %3553 = vst [vmem:[#allocation6_spill] sm:$0xff] %v3255_v12  ;;  %v3257_v13 = vpop.f32.mrb[25].mxu0  ;;  %v3259_v14 = vpop.f32.mrb[25].mxu1 }
 0x10e   :  { %v3261_v15 = vpop.f32.mrb[26].mxu0  ;;  %v3263_v16 = vpop.f32.mrb[26].mxu1 }
 0x10f   :  { %3554 = vst [vmem:[#allocation7_spill] sm:$0xff] %v3261_v15  ;;  %3555 = vst [vmem:[#allocation8_spill] sm:$0xff] %v3263_v16  ;;  %v3265_v17 = vpop.f32.mrb[27].mxu0  ;;  %v3267_v18 = vpop.f32.mrb[27].mxu1 }
 0x110   :  { %3556 = vst [vmem:[#allocation9_spill] sm:$0xff] %v3265_v17  ;;  %3557 = vst [vmem:[#allocation10_spill] sm:$0xff] %v3267_v18 }
 0x114   :  { %v3269_v19 = vpop.f32.mrb[28].mxu0  ;;  %v3271_v20 = vpop.f32.mrb[28].mxu1 }
 0x115   :  { %3558 = vst [vmem:[#allocation11_spill] sm:$0xff] %v3269_v19  ;;  %3559 = vst [vmem:[#allocation12_spill] sm:$0xff] %v3271_v20  ;;  %v3273_v21 = vpop.f32.mrb[29].mxu0  ;;  %v3275_v22 = vpop.f32.mrb[29].mxu1 }
 0x116   :  { %3560 = vst [vmem:[#allocation13_spill] sm:$0xff] %v3273_v21  ;;  %3561 = vst [vmem:[#allocation14_spill] sm:$0xff] %v3275_v22  ;;  %v3277_v23 = vpop.f32.mrb[30].mxu0  ;;  %v3279_v24 = vpop.f32.mrb[30].mxu1 }
 0x117   :  { %3562 = vst [vmem:[#allocation15_spill] sm:$0xff] %v3277_v23  ;;  %3563 = vst [vmem:[#allocation16_spill] sm:$0xff] %v3279_v24  ;;  %v3281_v25 = vpop.f32.mrb[31].mxu0  ;;  %v3283_v26 = vpop.f32.mrb[31].mxu1 }
 0x118   :  { %3564 = vst [vmem:[#allocation17_spill] sm:$0xff] %v3281_v25  ;;  %3565 = vst [vmem:[#allocation18_spill] sm:$0xff] %v3283_v26 }
 0x11c   :  { %v3285_v12 = vpop.f32.mrb[32].mxu0  ;;  %v3287_v11 = vpop.f32.mrb[32].mxu1 }
 0x11d   :  { %3566 = vst [vmem:[#allocation19_spill] sm:$0xff] %v3285_v12  ;;  %3567 = vst [vmem:[#allocation20_spill] sm:$0xff] %v3287_v11  ;;  %v3289_v18 = vpop.f32.mrb[33].mxu0  ;;  %v3291_v19 = vpop.f32.mrb[33].mxu1 }
 0x11e   :  { %3568 = vst [vmem:[#allocation21_spill] sm:$0xff] %v3289_v18  ;;  %3569 = vst [vmem:[#allocation22_spill] sm:$0xff] %v3291_v19  ;;  %v3293_v20 = vpop.f32.mrb[34].mxu0  ;;  %v3295_v21 = vpop.f32.mrb[34].mxu1 }
 0x11f   :  { %3570 = vst [vmem:[#allocation23_spill] sm:$0xff] %v3293_v20  ;;  %3571 = vst [vmem:[#allocation24_spill] sm:$0xff] %v3295_v21  ;;  %v3297_v22 = vpop.f32.mrb[35].mxu0  ;;  %v3299_v23 = vpop.f32.mrb[35].mxu1 }
 0x120   :  { %3572 = vst [vmem:[#allocation25_spill] sm:$0xff] %v3297_v22  ;;  %3573 = vst [vmem:[#allocation26_spill] sm:$0xff] %v3299_v23 }
 0x124   :  { %v3301_v24 = vpop.f32.mrb[36].mxu0  ;;  %v3303_v25 = vpop.f32.mrb[36].mxu1 }
 0x125   :  { %3574 = vst [vmem:[#allocation27_spill] sm:$0xff] %v3301_v24  ;;  %3575 = vst [vmem:[#allocation28_spill] sm:$0xff] %v3303_v25  ;;  %v3305_v26 = vpop.f32.mrb[37].mxu0  ;;  %v3307_v12 = vpop.f32.mrb[37].mxu1 }
 0x126   :  { %3576 = vst [vmem:[#allocation29_spill] sm:$0xff] %v3305_v26  ;;  %3577 = vst [vmem:[#allocation30_spill] sm:$0xff] %v3307_v12  ;;  %v3309_v11 = vpop.f32.mrb[38].mxu0  ;;  %v3311_v18 = vpop.f32.mrb[38].mxu1 }
 0x127   :  { %3578 = vst [vmem:[#allocation31_spill] sm:$0xff] %v3309_v11  ;;  %3579 = vst [vmem:[#allocation32_spill] sm:$0xff] %v3311_v18  ;;  %v3313_v19 = vpop.f32.mrb[39].mxu0  ;;  %v3315_v20 = vpop.f32.mrb[39].mxu1 }
 0x128   :  { %3580 = vst [vmem:[#allocation33_spill] sm:$0xff] %v3313_v19  ;;  %3581 = vst [vmem:[#allocation34_spill] sm:$0xff] %v3315_v20 }
 0x12c   :  { %v3317_v21 = vpop.f32.mrb[40].mxu0  ;;  %v3319_v22 = vpop.f32.mrb[40].mxu1 }
 0x12d   :  { %3582 = vst [vmem:[#allocation35_spill] sm:$0xff] %v3317_v21  ;;  %3583 = vst [vmem:[#allocation36_spill] sm:$0xff] %v3319_v22  ;;  %v3321_v23 = vpop.f32.mrb[41].mxu0  ;;  %v3323_v24 = vpop.f32.mrb[41].mxu1 }
 0x12e   :  { %3584 = vst [vmem:[#allocation37_spill] sm:$0xff] %v3321_v23  ;;  %3585 = vst [vmem:[#allocation38_spill] sm:$0xff] %v3323_v24  ;;  %v3325_v25 = vpop.f32.mrb[42].mxu0  ;;  %v2658_v26 = vpop.f32.mrb[42].mxu1 }
 0x12f   :  { %3586 = vst [vmem:[#allocation39_spill] sm:$0xff] %v3325_v25  ;;  %v1656_v18 = vmax.f32 %v3163_v30, %v2658_v26  ;;  %v3330_v12 = vpop.f32.mrb[43].mxu0  ;;  %v3332_v19 = vpop.f32.mrb[43].mxu1  ;;  %v3344_v26 = vld [vmem:[%s3543_s2] ss:$0 sm:$0xff] }
 0x130   :  { %3587 = vst [vmem:[#allocation40_spill] sm:$0xff] %v3330_v12  ;;  %3588 = vst [vmem:[#allocation41_spill] sm:$0xff] %v3332_v19 }
 0x134   :  { %v2573_v20 = vpop.f32.mrb[44].mxu0  ;;  %v2661_v21 = vpop.f32.mrb[44].mxu1 }
 0x135   :  { %v1614_v22 = vmax.f32 %v3165_v31, %v2573_v20  ;;  %v1659_v23 = vmax.f32 %v3167_v32, %v2661_v21  ;;  %v3336_v17 = vpop.f32.mrb[45].mxu0  ;;  %v1452_v24 = vpop.f32.mrb[45].mxu1 }
 0x136   :  { %3589 = vst [vmem:[#allocation42_spill] sm:$0xff] %v3336_v17  ;;  %v1657_v11 = vmax.f32 %v3171_v34, %v1452_v24  ;;  %v2574_v25 = vpop.f32.mrb[46].mxu0  ;;  %v2662_v30 = vpop.f32.mrb[46].mxu1 }
 0x137   :  { %v1615_v29 = vmax.f32 %v3177_v37, %v2574_v25  ;;  %v1660_v31 = vmax.f32 %v3179_v38, %v2662_v30  ;;  %v1103_v32 = vpop.f32.mrb[47].mxu0  ;;  %v1455_v20 = vpop.f32.mrb[47].mxu1 }
 0x138   :  { %v1700_v21 = vmax.f32 %v1614_v22, %v1657_v11  ;;  %v1613_v12 = vmax.f32 %v3157_v27, %v1103_v32  ;;  %v1658_v16 = vmax.f32 %v3159_v28, %v1455_v20 }
 0x13a   :  { %v1750_v34 = vadd.f32 %v3344_v26, %v1700_v21  ;;  %v1699_v24 = vmax.f32 %v1613_v12, %v1656_v18  ;;  %v1701_v17 = vmax.f32 %v1615_v29, %v1658_v16 }
 0x13c   :  { %v1749_v33 = vadd.f32 %v3344_v26, %v1699_v24  ;;  %v2577_v19 = vpop.f32.mrb[48].mxu0  ;;  %v2665_v15 = vpop.f32.mrb[48].mxu1  ;;  %v1793_v30 = vmax.f32 %v1750_v34, 0.0  ;;  %v1751_v29 = vadd.f32 %v3344_v26, %v1701_v17 }
 0x13d   :  { %v1618_v4 = vmax.f32 %v3181_v39, %v2577_v19  ;;  %v1663_v37 = vmax.f32 %v3183_v40, %v2665_v15  ;;  %v1116_v38 = vpop.f32.mrb[49].mxu0  ;;  %v1468_v25 = vpop.f32.mrb[49].mxu1 }
 0x13e   :  { %v1792_v11 = vmax.f32 %v1749_v33, 0.0  ;;  %v1616_v27 = vmax.f32 %v3185_v41, %v1116_v38  ;;  %v1661_v28 = vmax.f32 %v3187_v42, %v1468_v25  ;;  %v2578_v22 = vpop.f32.mrb[50].mxu0  ;;  %v2666_v32 = vpop.f32.mrb[50].mxu1 }
 0x13f   :  { %v1619_v12 = vmax.f32 %v3193_v45, %v2578_v22  ;;  %v1664_v16 = vmax.f32 %v3195_v46, %v2666_v32  ;;  %v1119_v18 = vpop.f32.mrb[51].mxu0  ;;  %v1471_v39 = vpop.f32.mrb[51].mxu1  ;;  %v1794_v46 = vmax.f32 %v1751_v29, 0.0 }
 0x140   :  { %v2321_v19 = vpack.c.bf16 %v1793_v30, %v1792_v11  ;;  %v1702_v40 = vmax.f32 %v1616_v27, %v1659_v23  ;;  %v1704_v15 = vmax.f32 %v1618_v4, %v1661_v28  ;;  %v1617_v20 = vmax.f32 %v3173_v35, %v1119_v18 }
 0x141   :  { %v1662_v33 = vmax.f32 %v3175_v36, %v1471_v39 }
 0x142   :  { %2418 = vst [vmem:[%s3544_s3 + $0x8] sm:$0xff] %v2321_v19   ;;  %v1752_v41 = vadd.f32 %v3344_v26, %v1702_v40  ;;  %v1754_v42 = vadd.f32 %v3344_v26, %v1704_v15  ;;  %v1703_v45 = vmax.f32 %v1617_v20, %v1660_v31 }
 0x143   :  { %v1705_v17 = vmax.f32 %v1619_v12, %v1662_v33 }
 0x144   :  { %v1795_v21 = vmax.f32 %v1752_v41, 0.0  ;;  %v1753_v34 = vadd.f32 %v3344_v26, %v1703_v45  ;;  %v2581_v23 = vpop.f32.mrb[52].mxu0  ;;  %v2669_v4 = vpop.f32.mrb[52].mxu1  ;;  %v1797_v24 = vmax.f32 %v1754_v42, 0.0 }
 0x145   :  { %v1622_v35 = vmax.f32 %v3197_v47, %v2581_v23  ;;  %v1667_v36 = vmax.f32 %v3199_v48, %v2669_v4  ;;  %v1132_v38 = vpop.f32.mrb[53].mxu0  ;;  %v1484_v25 = vpop.f32.mrb[53].mxu1  ;;  %v1755_v32 = vadd.f32 %v3344_v26, %v1705_v17 }
 0x146   :  { %v2326_v30 = vpack.c.bf16 %v1795_v21, %v1794_v46  ;;  %v1796_v11 = vmax.f32 %v1753_v34, 0.0  ;;  %v1620_v27 = vmax.f32 %v3201_v49, %v1132_v38  ;;  %v1665_v31 = vmax.f32 %v3203_v50, %v1484_v25  ;;  %v2582_v28 = vpop.f32.mrb[54].mxu0  ;;  %v2670_v22 = vpop.f32.mrb[54].mxu1 }
 0x147   :  { %v1623_v29 = vmax.f32 %v3209_v53, %v2582_v28  ;;  %v1668_v12 = vmax.f32 %v3211_v54, %v2670_v22  ;;  %v1135_v18 = vpop.f32.mrb[55].mxu0  ;;  %v1487_v47 = vpop.f32.mrb[55].mxu1  ;;  %v1798_v20 = vmax.f32 %v1755_v32, 0.0 }
 0x148   :  { %2419 = vst [vmem:[%s3544_s3 + $0x10] sm:$0xff] %v2326_v30   ;;  %v2331_v48 = vpack.c.bf16 %v1797_v24, %v1796_v11  ;;  %v1706_v39 = vmax.f32 %v1620_v27, %v1663_v37  ;;  %v1708_v19 = vmax.f32 %v1622_v35, %v1665_v31  ;;  %v1621_v49 = vmax.f32 %v3189_v43, %v1135_v18 }
 0x149   :  { %v1666_v50 = vmax.f32 %v3191_v44, %v1487_v47 }
 0x14a   :  { %2420 = vst [vmem:[%s3544_s3 + $0x18] sm:$0xff] %v2331_v48   ;;  %v1756_v53 = vadd.f32 %v3344_v26, %v1706_v39  ;;  %v1758_v54 = vadd.f32 %v3344_v26, %v1708_v19  ;;  %v1707_v40 = vmax.f32 %v1621_v49, %v1664_v16 }
 0x14b   :  { %v1709_v15 = vmax.f32 %v1623_v29, %v1666_v50 }
 0x14c   :  { %v1799_v33 = vmax.f32 %v1756_v53, 0.0  ;;  %v1757_v41 = vadd.f32 %v3344_v26, %v1707_v40  ;;  %v2585_v37 = vpop.f32.mrb[56].mxu0  ;;  %v2673_v42 = vpop.f32.mrb[56].mxu1  ;;  %v1801_v45 = vmax.f32 %v1758_v54, 0.0 }
 0x14d   :  { %v1626_v43 = vmax.f32 %v3213_v55, %v2585_v37  ;;  %v1671_v44 = vmax.f32 %v3215_v56, %v2673_v42  ;;  %v1148_v17 = vpop.f32.mrb[57].mxu0  ;;  %v1500_v46 = vpop.f32.mrb[57].mxu1  ;;  %v1759_v35 = vadd.f32 %v3344_v26, %v1709_v15 }
 0x14e   :  { %v2336_v21 = vpack.c.bf16 %v1799_v33, %v1798_v20  ;;  %v1800_v34 = vmax.f32 %v1757_v41, 0.0  ;;  %v1624_v23 = vmax.f32 %v3217_v57, %v1148_v17  ;;  %v1669_v16 = vmax.f32 %v3219_v58, %v1500_v46  ;;  %v2586_v4 = vpop.f32.mrb[58].mxu0  ;;  %v2674_v24 = vpop.f32.mrb[58].mxu1 }
 0x14f   :  { %v1627_v38 = vmax.f32 %v3225_v61, %v2586_v4  ;;  %v1672_v25 = vmax.f32 %v3227_v62, %v2674_v24  ;;  %v1151_v30 = vpop.f32.mrb[59].mxu0  ;;  %v1503_v55 = vpop.f32.mrb[59].mxu1  ;;  %v1802_v22 = vmax.f32 %v1759_v35, 0.0 }
 0x150   :  { %2421 = vst [vmem:[%s3544_s3 + $0x20] sm:$0xff] %v2336_v21   ;;  %v2341_v56 = vpack.c.bf16 %v1801_v45, %v1800_v34  ;;  %v1710_v11 = vmax.f32 %v1624_v23, %v1667_v36  ;;  %v1712_v27 = vmax.f32 %v1626_v43, %v1669_v16  ;;  %v1625_v57 = vmax.f32 %v3205_v51, %v1151_v30 }
 0x151   :  { %v1670_v58 = vmax.f32 %v3207_v52, %v1503_v55 }
 0x152   :  { %2422 = vst [vmem:[%s3544_s3 + $0x28] sm:$0xff] %v2341_v56   ;;  %v1760_v61 = vadd.f32 %v3344_v26, %v1710_v11  ;;  %v1762_v62 = vadd.f32 %v3344_v26, %v1712_v27  ;;  %v1711_v31 = vmax.f32 %v1625_v57, %v1668_v12 }
 0x153   :  { %v1713_v28 = vmax.f32 %v1627_v38, %v1670_v58 }
 0x154   :  { %v1803_v32 = vmax.f32 %v1760_v61, 0.0  ;;  %v1761_v29 = vadd.f32 %v3344_v26, %v1711_v31  ;;  %v2589_v36 = vpop.f32.mrb[60].mxu0  ;;  %v2677_v18 = vpop.f32.mrb[60].mxu1  ;;  %v1805_v47 = vmax.f32 %v1762_v62, 0.0 }
 0x155   :  { %v1630_v51 = vmax.f32 %v3229_v63, %v2589_v36  ;;  %v1675_v52 = vmax.f32 %v3231_v0, %v2677_v18  ;;  %v1164_v48 = vpop.f32.mrb[61].mxu0  ;;  %v1516_v39 = vpop.f32.mrb[61].mxu1  ;;  %v1763_v40 = vadd.f32 %v3344_v26, %v1713_v28 }
 0x156   :  { %v2346_v19 = vpack.c.bf16 %v1803_v32, %v1802_v22  ;;  %v1804_v49 = vmax.f32 %v1761_v29, 0.0  ;;  %v1628_v50 = vmax.f32 %v3233_v1, %v1164_v48  ;;  %v1673_v12 = vmax.f32 %v3235_v2, %v1516_v39  ;;  %v2590_v53 = vpop.f32.mrb[62].mxu0  ;;  %v2678_v54 = vpop.f32.mrb[62].mxu1 }
 0x157   :  { %v1631_v15 = vmax.f32 %v3241_v5, %v2590_v53  ;;  %v1676_v20 = vmax.f32 %v3243_v6, %v2678_v54  ;;  %v1167_v33 = vpop.f32.mrb[63].mxu0  ;;  %v1519_v63 = vpop.f32.mrb[63].mxu1  ;;  %v1806_v43 = vmax.f32 %v1763_v40, 0.0  ;;  %v3594_v53 = vld [vmem:[#allocation10_spill] sm:$0xff] }
 0x158   :  { %2423 = vst [vmem:[%s3544_s3 + $0x30] sm:$0xff] %v2346_v19   ;;  %v2351_v0 = vpack.c.bf16 %v1805_v47, %v1804_v49  ;;  %v1714_v41 = vmax.f32 %v1628_v50, %v1671_v44  ;;  %v1716_v37 = vmax.f32 %v1630_v51, %v1673_v12  ;;  %v1629_v1 = vmax.f32 %v3221_v59, %v1167_v33  ;;  %v3592_v51 = vld [vmem:[#allocation8_spill] sm:$0xff]  ;;  %v3593_v50 = vld [vmem:[#allocation9_spill] sm:$0xff] }
 0x159   :  { %v1674_v2 = vmax.f32 %v3223_v60, %v1519_v63  ;;  %v3595_v33 = vld [vmem:[#allocation13_spill] sm:$0xff] }
 0x15a   :  { %2424 = vst [vmem:[%s3544_s3 + $0x38] sm:$0xff] %v2351_v0   ;;  %v1764_v5 = vadd.f32 %v3344_v26, %v1714_v41  ;;  %v1766_v6 = vadd.f32 %v3344_v26, %v1716_v37  ;;  %v1715_v42 = vmax.f32 %v1629_v1, %v1672_v25  ;;  %v3596_v0 = vld [vmem:[#allocation14_spill] sm:$0xff] }
 0x15b   :  { %v1717_v45 = vmax.f32 %v1631_v15, %v1674_v2 }
 0x15c   :  { %v1807_v17 = vmax.f32 %v1764_v5, 0.0  ;;  %v1765_v46 = vadd.f32 %v3344_v26, %v1715_v42  ;;  %v2593_v44 = vpop.f32.mrb[64].mxu0  ;;  %v2681_v21 = vpop.f32.mrb[64].mxu1  ;;  %v1809_v34 = vmax.f32 %v1766_v6, 0.0  ;;  %v3597_v42 = vld [vmem:[#allocation5_spill] sm:$0xff] }
 0x15d   :  { %v1634_v59 = vmax.f32 %v3245_v7, %v2593_v44  ;;  %v1679_v60 = vmax.f32 %v3247_v8, %v2681_v21  ;;  %v1180_v23 = vpop.f32.mrb[65].mxu0  ;;  %v1532_v16 = vpop.f32.mrb[65].mxu1  ;;  %v1767_v55 = vadd.f32 %v3344_v26, %v1717_v45 }
 0x15e   :  { %v2356_v4 = vpack.c.bf16 %v1807_v17, %v1806_v43  ;;  %v1808_v24 = vmax.f32 %v1765_v46, 0.0  ;;  %v1632_v35 = vmax.f32 %v3249_v9, %v1180_v23  ;;  %v1677_v38 = vmax.f32 %v3251_v10, %v1532_v16  ;;  %v2594_v25 = vpop.f32.mrb[66].mxu0  ;;  %v2682_v30 = vpop.f32.mrb[66].mxu1  ;;  %v3590_v10 = vld [vmem:[#allocation4_spill] sm:$0xff]  ;;  %v3598_v43 = vld [vmem:[#allocation6_spill] sm:$0xff] }
 0x15f   :  { %v1635_v56 = vmax.f32 %v3257_v13, %v2594_v25  ;;  %v1680_v11 = vmax.f32 %v3259_v14, %v2682_v30  ;;  %v1183_v27 = vpop.f32.mrb[67].mxu0  ;;  %v1535_v7 = vpop.f32.mrb[67].mxu1  ;;  %v1810_v28 = vmax.f32 %v1767_v55, 0.0  ;;  %v3600_v25 = vld [vmem:[#allocation16_spill] sm:$0xff] }
 0x160   :  { %2425 = vst [vmem:[%s3544_s3 + $0x40] sm:$0xff] %v2356_v4   ;;  %v2361_v8 = vpack.c.bf16 %v1809_v34, %v1808_v24  ;;  %v1718_v57 = vmax.f32 %v1632_v35, %v1675_v52  ;;  %v1720_v58 = vmax.f32 %v1634_v59, %v1677_v38  ;;  %v1633_v9 = vmax.f32 %v3237_v3, %v1183_v27  ;;  %v3591_v3 = vld [vmem:[#allocation7_spill] sm:$0xff] }
 0x161   :  { %v1678_v61 = vmax.f32 %v3590_v10, %v1535_v7  ;;  %v3599_v35 = vld [vmem:[#allocation15_spill] sm:$0xff] }
 0x162   :  { %2426 = vst [vmem:[%s3544_s3 + $0x48] sm:$0xff] %v2361_v8   ;;  %v1768_v13 = vadd.f32 %v3344_v26, %v1718_v57  ;;  %v1770_v14 = vadd.f32 %v3344_v26, %v1720_v58  ;;  %v1719_v62 = vmax.f32 %v1633_v9, %v1676_v20  ;;  %v3601_v8 = vld [vmem:[#allocation17_spill] sm:$0xff]  ;;  %v3602_v58 = vld [vmem:[#allocation18_spill] sm:$0xff] }
 0x163   :  { %v1721_v31 = vmax.f32 %v1635_v56, %v1678_v61 }
 0x164   :  { %v1811_v22 = vmax.f32 %v1768_v13, 0.0  ;;  %v1769_v32 = vadd.f32 %v3344_v26, %v1719_v62  ;;  %v2597_v29 = vpop.f32.mrb[68].mxu0  ;;  %v2685_v36 = vpop.f32.mrb[68].mxu1  ;;  %v1813_v18 = vmax.f32 %v1770_v14, 0.0  ;;  %v3603_v13 = vld [vmem:[#allocation21_spill] sm:$0xff]  ;;  %v3604_v62 = vld [vmem:[#allocation22_spill] sm:$0xff] }
 0x165   :  { %v1638_v47 = vmax.f32 %v3591_v3, %v2597_v29  ;;  %v1683_v52 = vmax.f32 %v3592_v51, %v2685_v36  ;;  %v1196_v48 = vpop.f32.mrb[69].mxu0  ;;  %v1548_v39 = vpop.f32.mrb[69].mxu1  ;;  %v1771_v20 = vadd.f32 %v3344_v26, %v1721_v31 }
 0x166   :  { %v2366_v19 = vpack.c.bf16 %v1811_v22, %v1810_v28  ;;  %v1812_v49 = vmax.f32 %v1769_v32, 0.0  ;;  %v1636_v12 = vmax.f32 %v3593_v50, %v1196_v48  ;;  %v1681_v54 = vmax.f32 %v3594_v53, %v1548_v39  ;;  %v2598_v40 = vpop.f32.mrb[70].mxu0  ;;  %v2686_v15 = vpop.f32.mrb[70].mxu1 }
 0x167   :  { %v1639_v63 = vmax.f32 %v3595_v33, %v2598_v40  ;;  %v1684_v41 = vmax.f32 %v3596_v0, %v2686_v15  ;;  %v1199_v37 = vpop.f32.mrb[71].mxu0  ;;  %v1551_v1 = vpop.f32.mrb[71].mxu1  ;;  %v1814_v59 = vmax.f32 %v1771_v20, 0.0  ;;  %v3607_v15 = vld [vmem:[#allocation23_spill] sm:$0xff]  ;;  %v3608_v33 = vld [vmem:[#allocation24_spill] sm:$0xff] }
 0x168   :  { %2427 = vst [vmem:[%s3544_s3 + $0x50] sm:$0xff] %v2366_v19   ;;  %v2371_v2 = vpack.c.bf16 %v1813_v18, %v1812_v49  ;;  %v1722_v5 = vmax.f32 %v1636_v12, %v1679_v60  ;;  %v1724_v6 = vmax.f32 %v1638_v47, %v1681_v54  ;;  %v1637_v45 = vmax.f32 %v3597_v42, %v1199_v37  ;;  %v3605_v18 = vld [vmem:[#allocation11_spill] sm:$0xff]  ;;  %v3606_v47 = vld [vmem:[#allocation12_spill] sm:$0xff]  ;;  %v3610_v42 = vld [vmem:[#allocation26_spill] sm:$0xff] }
 0x169   :  { %v1682_v17 = vmax.f32 %v3598_v43, %v1551_v1 }
 0x16a   :  { %2428 = vst [vmem:[%s3544_s3 + $0x58] sm:$0xff] %v2371_v2   ;;  %v1772_v46 = vadd.f32 %v3344_v26, %v1722_v5  ;;  %v1774_v44 = vadd.f32 %v3344_v26, %v1724_v6  ;;  %v1723_v21 = vmax.f32 %v1637_v45, %v1680_v11  ;;  %v3609_v5 = vld [vmem:[#allocation25_spill] sm:$0xff] }
 0x16b   :  { %v1725_v34 = vmax.f32 %v1639_v63, %v1682_v17 }
 0x16c   :  { %v1815_v23 = vmax.f32 %v1772_v46, 0.0  ;;  %v1773_v16 = vadd.f32 %v3344_v26, %v1723_v21  ;;  %v2601_v60 = vpop.f32.mrb[72].mxu0  ;;  %v2689_v4 = vpop.f32.mrb[72].mxu1  ;;  %v1817_v24 = vmax.f32 %v1774_v44, 0.0  ;;  %v3611_v46 = vld [vmem:[#allocation29_spill] sm:$0xff]  ;;  %v3612_v21 = vld [vmem:[#allocation30_spill] sm:$0xff] }
 0x16d   :  { %v1642_v38 = vmax.f32 %v3599_v35, %v2601_v60  ;;  %v1687_v30 = vmax.f32 %v3600_v25, %v2689_v4  ;;  %v1212_v55 = vpop.f32.mrb[73].mxu0  ;;  %v1564_v56 = vpop.f32.mrb[73].mxu1  ;;  %v1775_v61 = vadd.f32 %v3344_v26, %v1725_v34 }
 0x16e   :  { %v2376_v27 = vpack.c.bf16 %v1815_v23, %v1814_v59  ;;  %v1816_v7 = vmax.f32 %v1773_v16, 0.0  ;;  %v1640_v57 = vmax.f32 %v3601_v8, %v1212_v55  ;;  %v1685_v11 = vmax.f32 %v3602_v58, %v1564_v56  ;;  %v2602_v9 = vpop.f32.mrb[74].mxu0  ;;  %v2690_v10 = vpop.f32.mrb[74].mxu1 }
 0x16f   :  { %v1643_v14 = vmax.f32 %v3603_v13, %v2602_v9  ;;  %v1688_v31 = vmax.f32 %v3604_v62, %v2690_v10  ;;  %v1215_v28 = vpop.f32.mrb[75].mxu0  ;;  %v1567_v22 = vpop.f32.mrb[75].mxu1  ;;  %v1818_v50 = vmax.f32 %v1775_v61, 0.0  ;;  %v3615_v10 = vld [vmem:[#allocation31_spill] sm:$0xff]  ;;  %v3616_v13 = vld [vmem:[#allocation32_spill] sm:$0xff] }
 0x170   :  { %2429 = vst [vmem:[%s3544_s3 + $0x60] sm:$0xff] %v2376_v27   ;;  %v2381_v32 = vpack.c.bf16 %v1817_v24, %v1816_v7  ;;  %v1726_v29 = vmax.f32 %v1640_v57, %v1683_v52  ;;  %v1728_v36 = vmax.f32 %v1642_v38, %v1685_v11  ;;  %v1641_v3 = vmax.f32 %v3605_v18, %v1215_v28  ;;  %v3613_v24 = vld [vmem:[#allocation19_spill] sm:$0xff]  ;;  %v3614_v38 = vld [vmem:[#allocation20_spill] sm:$0xff]  ;;  %v3618_v18 = vld [vmem:[#allocation34_spill] sm:$0xff] }
 0x171   :  { %v1686_v51 = vmax.f32 %v3606_v47, %v1567_v22 }
 0x172   :  { %2430 = vst [vmem:[%s3544_s3 + $0x68] sm:$0xff] %v2381_v32   ;;  %v1776_v48 = vadd.f32 %v3344_v26, %v1726_v29  ;;  %v1778_v39 = vadd.f32 %v3344_v26, %v1728_v36  ;;  %v1727_v19 = vmax.f32 %v1641_v3, %v1684_v41  ;;  %v3617_v29 = vld [vmem:[#allocation33_spill] sm:$0xff] }
 0x173   :  { %v1729_v49 = vmax.f32 %v1643_v14, %v1686_v51 }
 0x174   :  { %v1819_v12 = vmax.f32 %v1776_v48, 0.0  ;;  %v1777_v53 = vadd.f32 %v3344_v26, %v1727_v19  ;;  %v2605_v52 = vpop.f32.mrb[76].mxu0  ;;  %v2693_v54 = vpop.f32.mrb[76].mxu1  ;;  %v1821_v40 = vmax.f32 %v1778_v39, 0.0  ;;  %v3619_v48 = vld [vmem:[#allocation37_spill] sm:$0xff]  ;;  %v3620_v19 = vld [vmem:[#allocation38_spill] sm:$0xff] }
 0x175   :  { %v1646_v20 = vmax.f32 %v3607_v15, %v2605_v52  ;;  %v1691_v63 = vmax.f32 %v3608_v33, %v2693_v54  ;;  %v1228_v0 = vpop.f32.mrb[77].mxu0  ;;  %v1580_v37 = vpop.f32.mrb[77].mxu1  ;;  %v1779_v17 = vadd.f32 %v3344_v26, %v1729_v49 }
 0x176   :  { %v2386_v1 = vpack.c.bf16 %v1819_v12, %v1818_v50  ;;  %v1820_v2 = vmax.f32 %v1777_v53, 0.0  ;;  %v1644_v6 = vmax.f32 %v3609_v5, %v1228_v0  ;;  %v1689_v41 = vmax.f32 %v3610_v42, %v1580_v37  ;;  %v2606_v45 = vpop.f32.mrb[78].mxu0  ;;  %v2694_v43 = vpop.f32.mrb[78].mxu1 }
 0x177   :  { %v1647_v44 = vmax.f32 %v3611_v46, %v2606_v45  ;;  %v1692_v34 = vmax.f32 %v3612_v21, %v2694_v43  ;;  %v1231_v59 = vpop.f32.mrb[79].mxu0  ;;  %v1583_v23 = vpop.f32.mrb[79].mxu1  ;;  %v1822_v8 = vmax.f32 %v1779_v17, 0.0  ;;  %v3624_v21 = vld [vmem:[#allocation40_spill] sm:$0xff] }
 0x178   :  { %2431 = vst [vmem:[%s3544_s3 + $0x70] sm:$0xff] %v2386_v1   ;;  %v2391_v16 = vpack.c.bf16 %v1821_v40, %v1820_v2  ;;  %v1730_v60 = vmax.f32 %v1644_v6, %v1687_v30  ;;  %v1732_v4 = vmax.f32 %v1646_v20, %v1689_v41  ;;  %v1645_v35 = vmax.f32 %v3613_v24, %v1231_v59  ;;  %v3621_v40 = vld [vmem:[#allocation27_spill] sm:$0xff]  ;;  %v3622_v20 = vld [vmem:[#allocation28_spill] sm:$0xff]  ;;  %v3623_v41 = vld [vmem:[#allocation41_spill] sm:$0xff] }
 0x179   :  { %v1690_v25 = vmax.f32 %v3614_v38, %v1583_v23 }
 0x17a   :  { %2432 = vst [vmem:[%s3544_s3 + $0x78] sm:$0xff] %v2391_v16   ;;  %v1780_v55 = vadd.f32 %v3344_v26, %v1730_v60  ;;  %v1782_v56 = vadd.f32 %v3344_v26, %v1732_v4  ;;  %v1731_v27 = vmax.f32 %v1645_v35, %v1688_v31  ;;  %v3625_v16 = vld [vmem:[#allocation2_spill] sm:$0xff]  ;;  %v3626_v60 = vld [vmem:[#allocation39_spill] sm:$0xff] }
 0x17b   :  { %v1733_v7 = vmax.f32 %v1647_v44, %v1690_v25  ;;  %v3627_v4 = vmax.f32 %v3625_v16, %v3626_v60 }
 0x17c   :  { %v1823_v57 = vmax.f32 %v1780_v55, 0.0  ;;  %v1781_v58 = vadd.f32 %v3344_v26, %v1731_v27  ;;  %v2609_v30 = vpop.f32.mrb[80].mxu0  ;;  %v2697_v11 = vpop.f32.mrb[80].mxu1  ;;  %v1825_v9 = vmax.f32 %v1782_v56, 0.0  ;;  %v3629_v27 = vld [vmem:[#allocation35_spill] sm:$0xff] }
 0x17d   :  { %v1650_v61 = vmax.f32 %v3615_v10, %v2609_v30  ;;  %v1695_v14 = vmax.f32 %v3616_v13, %v2697_v11  ;;  %v1244_v62 = vpop.f32.mrb[81].mxu0  ;;  %v1596_v28 = vpop.f32.mrb[81].mxu1  ;;  %v1783_v51 = vadd.f32 %v3344_v26, %v1733_v7 }
 0x17e   :  { %v2396_v22 = vpack.c.bf16 %v1823_v57, %v1822_v8  ;;  %v1824_v32 = vmax.f32 %v1781_v58, 0.0  ;;  %v1648_v36 = vmax.f32 %v3617_v29, %v1244_v62  ;;  %v1693_v31 = vmax.f32 %v3618_v18, %v1596_v28  ;;  %v2610_v3 = vpop.f32.mrb[82].mxu0  ;;  %v2698_v47 = vpop.f32.mrb[82].mxu1  ;;  %v3630_v57 = vld [vmem:[#allocation3_spill] sm:$0xff]  ;;  %v3631_v58 = vld [vmem:[#allocation42_spill] sm:$0xff] }
 0x17f   :  { %v1651_v39 = vmax.f32 %v3619_v48, %v2610_v3  ;;  %v1696_v49 = vmax.f32 %v3620_v19, %v2698_v47  ;;  %v1247_v50 = vpop.f32.mrb[83].mxu0  ;;  %v1599_v12 = vpop.f32.mrb[83].mxu1  ;;  %v1826_v5 = vmax.f32 %v1783_v51, 0.0  ;;  %v3632_v30 = vmax.f32 %v3630_v57, %v3631_v58 }
 0x180   :  { %2433 = vst [vmem:[%s3544_s3 + $0x80] sm:$0xff] %v2396_v22   ;;  %v2401_v53 = vpack.c.bf16 %v1825_v9, %v1824_v32  ;;  %v1734_v52 = vmax.f32 %v1648_v36, %v1691_v63  ;;  %v1736_v54 = vmax.f32 %v1650_v61, %v1693_v31  ;;  %v1649_v15 = vmax.f32 %v3621_v40, %v1247_v50 }
 0x181   :  { %v1694_v33 = vmax.f32 %v3622_v20, %v1599_v12 }
 0x182   :  { %2434 = vst [vmem:[%s3544_s3 + $0x88] sm:$0xff] %v2401_v53   ;;  %v1784_v0 = vadd.f32 %v3344_v26, %v1734_v52  ;;  %v1786_v37 = vadd.f32 %v3344_v26, %v1736_v54  ;;  %v1735_v1 = vmax.f32 %v1649_v15, %v1692_v34  ;;  %v3628_v34 = vld [vmem:[#allocation36_spill] sm:$0xff] }
 0x183   :  { %v1737_v2 = vmax.f32 %v1651_v39, %v1694_v33 }
 0x184   :  { %v1827_v6 = vmax.f32 %v1784_v0, 0.0  ;;  %v1785_v42 = vadd.f32 %v3344_v26, %v1735_v1  ;;  %v2613_v63 = vpop.f32.mrb[84].mxu0  ;;  %v1829_v46 = vmax.f32 %v1786_v37, 0.0 }
 0x185   :  { %v1654_v45 = vmax.f32 %v2613_v63, %v3623_v41  ;;  %v1260_v43 = vpop.f32.mrb[85].mxu0  ;;  %v1787_v55 = vadd.f32 %v3344_v26, %v1737_v2 }
 0x186   :  { %v2406_v17 = vpack.c.bf16 %v1827_v6, %v1826_v5  ;;  %v1828_v44 = vmax.f32 %v1785_v42, 0.0  ;;  %v1652_v59 = vmax.f32 %v3624_v21, %v1260_v43  ;;  %v2614_v23 = vpop.f32.mrb[86].mxu0 }
 0x187   :  { %v1697_v24 = vmax.f32 %v3627_v4, %v1654_v45  ;;  %v1655_v35 = vmax.f32 %v2614_v23, %v3628_v34  ;;  %v1263_v38 = vpop.f32.mrb[87].mxu0  ;;  %v1830_v13 = vmax.f32 %v1787_v55, 0.0 }
 0x188   :  { %2435 = vst [vmem:[%s3544_s3 + $0x90] sm:$0xff] %v2406_v17   ;;  %v2411_v25 = vpack.c.bf16 %v1829_v46, %v1828_v44  ;;  %v1738_v56 = vmax.f32 %v1652_v59, %v1695_v14  ;;  %v1653_v7 = vmax.f32 %v3629_v27, %v1263_v38 }
 0x189   :  { %v1747_v8 = vadd.f32 %v3344_v26, %v1697_v24  ;;  %v1698_v11 = vmax.f32 %v3632_v30, %v1655_v35 }
 0x18a   :  { %2436 = vst [vmem:[%s3544_s3 + $0x98] sm:$0xff] %v2411_v25   ;;  %v1788_v9 = vadd.f32 %v3344_v26, %v1738_v56  ;;  %v1739_v10 = vmax.f32 %v1653_v7, %v1696_v49 }
 0x18b   :  { %v1748_v61 = vadd.f32 %v3344_v26, %v1698_v11  ;;  %v1790_v28 = vmax.f32 %v1747_v8, 0.0 }
 0x18c   :  { %v1831_v62 = vmax.f32 %v1788_v9, 0.0  ;;  %v1789_v14 = vadd.f32 %v3344_v26, %v1739_v10 }
 0x18d   :  { %v1791_v22 = vmax.f32 %v1748_v61, 0.0 }
 0x18e   :  { %v2416_v32 = vpack.c.bf16 %v1831_v62, %v1830_v13  ;;  %v1832_v29 = vmax.f32 %v1789_v14, 0.0 }
 0x18f   :  { %v2316_v36 = vpack.c.bf16 %v1791_v22, %v1790_v28 }
 0x190   :  { %2437 = vst [vmem:[%s3544_s3 + $0xa0] sm:$0xff] %v2416_v32   ;;  %v2312_v18 = vpack.c.bf16 %v1832_v29, %v1832_v29 }
 0x191   :  { %2317 = vst [vmem:[%s3544_s3] sm:$0xff] %v2316_v36  }
 0x192   :  { %2048 = vst [vmem:[%s3544_s3 + $0xa8] sm:$0xf] %v2312_v18 }

</bundles_post_ra>
